<compile_context>
chip_gen: v6e
topology: v6e:2x2x1
jax: 0.10.0
libtpu: 0.0.40
codegen_flags: <defaults>
</compile_context>

<pallas_src>
import jax
import jax.numpy as jnp
from jax.experimental import pallas as pl
from jax.experimental.pallas import tpu as pltpu


def _tranconv1_fused_kernel(x_ref, w_ref, b_ref, o_ref):
    # x_ref: (Cin,  tn)   one spatial tile of one batch element (input dtype)
    # w_ref: (Cout, Cin)  fused 1x1-conv weight, float32, resident
    # b_ref: (Cout, 1)    fused bias, float32, resident
    # o_ref: (Cout, tn)
    x = x_ref[...].astype(w_ref.dtype)
    y = jnp.dot(w_ref[...], x, preferred_element_type=jnp.float32) + b_ref[...]
    o_ref[...] = y.astype(o_ref.dtype)


def tranconv1_pallas(x_nchw, w1, b1, w2, b2, *,
                     target_block_bytes=2 * 1024 * 1024,
                     act_vmem_budget=24 * 1024 * 1024):
    """Forward of tranconv1: Conv2d(in,out,1) -> Conv2d(out,out,1), no act.

    x_nchw: (N, Cin, H, W)
    w1: (Cmid, Cin), b1: (Cmid,), w2: (Cout, Cmid), b2: (Cout,)
    """
    N, Cin, H, W = x_nchw.shape
    Cout = w2.shape[0]
    HW = H * W
    dtype = x_nchw.dtype
    itemsize = jnp.dtype(dtype).itemsize

    # --- Fuse the two affine 1x1 convs (exact in real arithmetic); keep f32 --
    w_f = w2.astype(jnp.float32) @ w1.astype(jnp.float32)                # (Cout, Cin) f32
    b_f = (w2.astype(jnp.float32) @ b1.astype(jnp.float32)
           + b2.astype(jnp.float32)).reshape(Cout, 1)                    # (Cout, 1)  f32

    # --- Free reshape: channels-first, merged spatial axis ------------------
    x3 = x_nchw.reshape(N, Cin, HW)

    # --- Spatial tile sizing: ~2 MB of input per grid step, VMEM-capped -----
    per_lane_vmem = 2 * (Cin + Cout) * itemsize          # double-buffered in+out
    max_tn_vmem = max((act_vmem_budget // per_lane_vmem) // 128 * 128, 128)
    tn_target = max((target_block_bytes // (Cin * itemsize)) // 128 * 128, 128)
    tn = min(max_tn_vmem, tn_target)

    whole_fits = HW <= tn
    if whole_fits and (N >= 2 or HW % 256 != 0 or HW < 256):
        # Whole spatial extent per step: block dim == full array dim, so no
        # 128-divisibility requirement and no padding / slicing at all.
        tn_eff = HW
        num_tiles = 1
        HW_pad = HW
        x_in = x3
    elif whole_fits:
        # N == 1 and HW a multiple of 256: split spatially in two so both
        # v7x TensorCores get a parallel step; still no padding.
        tn_eff = HW // 2
        num_tiles = 2
        HW_pad = HW
        x_in = x3
    else:
        tn_eff = tn                                      # multiple of 128
        HW_pad = pl.cdiv(HW, tn_eff) * tn_eff
        num_tiles = HW_pad // tn_eff
        x_in = x3 if HW_pad == HW else jnp.pad(
            x3, ((0, 0), (0, 0), (0, HW_pad - HW)))

    grid = (N, num_tiles)

    # --- VMEM limit: actual need + headroom, capped for v7x (64 MiB phys) ---
    vmem_need = (2 * (Cin + Cout) * tn_eff * itemsize
                 + Cout * Cin * 4 + Cout * 4)
    vmem_limit = int(min(max(2 * vmem_need, 16 * 1024 * 1024),
                         48 * 1024 * 1024))

    cost = pl.CostEstimate(
        flops=int(2 * N * Cout * Cin * HW_pad),
        transcendentals=0,
        bytes_accessed=int(N * (Cin + Cout) * HW_pad * itemsize
                           + Cout * Cin * 4 + Cout * 4),
    )

    out3 = pl.pallas_call(
        _tranconv1_fused_kernel,
        out_shape=jax.ShapeDtypeStruct((N, Cout, HW_pad), dtype),
        grid_spec=pltpu.PrefetchScalarGridSpec(
            num_scalar_prefetch=0,
            grid=grid,
            in_specs=[
                # activation tile: (1, Cin, tn) with batch dim squeezed
                pl.BlockSpec((None, Cin, tn_eff), lambda n, j: (n, 0, j)),
                # fused weight / bias: constant index_map -> resident in VMEM
                pl.BlockSpec((Cout, Cin), lambda n, j: (0, 0)),
                pl.BlockSpec((Cout, 1), lambda n, j: (0, 0)),
            ],
            out_specs=pl.BlockSpec((None, Cout, tn_eff), lambda n, j: (n, 0, j)),
        ),
        compiler_params=pltpu.CompilerParams(
            dimension_semantics=("parallel", "parallel"),
            vmem_limit_bytes=vmem_limit),
        cost_estimate=cost,
    )(x_in, w_f, b_f)

    # Drop spatial padding only if it was actually added, restore NCHW.
    if HW_pad != HW:
        out3 = out3[:, :, :HW]
    return out3.reshape(N, Cout, H, W)


def _init_params(key, in_ch):
    out_ch = in_ch // 2
    k1, k2, k3, k4 = jax.random.split(key, 4)
    bound1 = 1.0 / (in_ch ** 0.5)
    bound2 = 1.0 / (out_ch ** 0.5)
    w1 = jax.random.uniform(k1, (out_ch, in_ch), jnp.float32, -bound1, bound1)
    b1 = jax.random.uniform(k2, (out_ch,), jnp.float32, -bound1, bound1)
    w2 = jax.random.uniform(k3, (out_ch, out_ch), jnp.float32, -bound2, bound2)
    b2 = jax.random.uniform(k4, (out_ch,), jnp.float32, -bound2, bound2)
    return w1, b1, w2, b2


if __name__ == "__main__":
    key = jax.random.PRNGKey(0)
    kx, kp = jax.random.split(key)

    N, in_ch, H, W = 2, 8, 16, 16          # out_ch = 4
    x = jax.random.normal(kx, (N, in_ch, H, W), jnp.float32)
    w1, b1, w2, b2 = _init_params(kp, in_ch)

    y = tranconv1_pallas(x, w1, b1, w2, b2)
    y = jax.block_until_ready(y)

    # Reference: two 1x1 convs == two per-pixel channel matmuls.
    h_ref = jnp.einsum("nchw,oc->nohw", x, w1) + b1[None, :, None, None]
    y_ref = jnp.einsum("nchw,oc->nohw", h_ref, w2) + b2[None, :, None, None]
    assert y.shape == (N, in_ch // 2, H, W)
    # Fusion reorders float ops -> tiny numerical differences are expected.
    assert jnp.allclose(y, y_ref, atol=1e-5, rtol=1e-5)

    print("KERNEL_OK")
</pallas_src>

<mosaic_0001>
module attributes {stable_mosaic.version = 11 : i64} {
  func.func @_tranconv1_fused_kernel(%arg0: i32, %arg1: i32, %arg2: memref<1x8x256xf32, #tpu.memory_space<vmem>>, %arg3: memref<4x8xf32, #tpu.memory_space<vmem>>, %arg4: memref<4x1xf32, #tpu.memory_space<vmem>>, %arg5: memref<1x4x256xf32, #tpu.memory_space<vmem>>) attributes {dimension_semantics = [#tpu.dimension_semantics<parallel>, #tpu.dimension_semantics<parallel>], iteration_bounds = array<i64: 2, 1>, scalar_prefetch = 0 : i64, scratch_operands = 0 : i64, tpu.core_type = #tpu.core_type<tc>, window_params = [{transform_indices = @transform_0, window_bounds = array<i64: 1, 8, 256>}, {pipeline_mode = #tpu.pipeline_mode<synchronous>, transform_indices = @transform_1, window_bounds = array<i64: 4, 8>}, {pipeline_mode = #tpu.pipeline_mode<synchronous>, transform_indices = @transform_2, window_bounds = array<i64: 4, 1>}, {transform_indices = @transform_3, window_bounds = array<i64: 1, 4, 256>}]} {
    %c0 = arith.constant 0 : index
    %c0_0 = arith.constant 0 : index
    %c0_1 = arith.constant 0 : index
    %0 = vector.load %arg2[%c0, %c0_0, %c0_1] : memref<1x8x256xf32, #tpu.memory_space<vmem>>, vector<1x8x256xf32>
    %1 = vector.shape_cast %0 : vector<1x8x256xf32> to vector<8x256xf32>
    %c0_2 = arith.constant 0 : index
    %c0_3 = arith.constant 0 : index
    %2 = vector.load %arg3[%c0_2, %c0_3] : memref<4x8xf32, #tpu.memory_space<vmem>>, vector<4x8xf32>
    %cst = arith.constant dense<0.000000e+00> : vector<4x256xf32>
    %3 = tpu.matmul %2, %1, %cst {dimension_numbers = #tpu.dot_dimension_numbers<[1], [0], [0], [1], [0, 0, 1, 1], [], []>} : vector<4x8xf32>, vector<8x256xf32>, vector<4x256xf32> -> vector<4x256xf32>
    %c0_4 = arith.constant 0 : index
    %c0_5 = arith.constant 0 : index
    %4 = vector.load %arg4[%c0_4, %c0_5] : memref<4x1xf32, #tpu.memory_space<vmem>>, vector<4x1xf32>
    %5 = vector.broadcast %4 : vector<4x1xf32> to vector<4x256xf32>
    %6 = arith.addf %3, %5 : vector<4x256xf32>
    %c0_6 = arith.constant 0 : index
    %c0_7 = arith.constant 0 : index
    %c0_8 = arith.constant 0 : index
    %7 = vector.load %arg5[%c0_6, %c0_7, %c0_8] : memref<1x4x256xf32, #tpu.memory_space<vmem>>, vector<1x4x256xf32>
    %8 = vector.shape_cast %7 : vector<1x4x256xf32> to vector<4x256xf32>
    %9 = vector.shape_cast %6 : vector<4x256xf32> to vector<1x4x256xf32>
    tpu.vector_store %arg5[%c0_6, %c0_7, %c0_8], %9 {strides = array<i32>} : memref<1x4x256xf32, #tpu.memory_space<vmem>>, vector<1x4x256xf32>,
    return
  }
  func.func @transform_0(%arg0: i32, %arg1: i32) -> (i32, i32, i32) {
    %c0_i32 = arith.constant 0 : i32
    %c0_i32_0 = arith.constant 0 : i32
    return %arg0, %c0_i32, %arg1 : i32, i32, i32
  }
  func.func @transform_1(%arg0: i32, %arg1: i32) -> (i32, i32) {
    %c0_i32 = arith.constant 0 : i32
    %c0_i32_0 = arith.constant 0 : i32
    %c0_i32_1 = arith.constant 0 : i32
    return %c0_i32, %c0_i32_0 : i32, i32
  }
  func.func @transform_2(%arg0: i32, %arg1: i32) -> (i32, i32) {
    %c0_i32 = arith.constant 0 : i32
    %c0_i32_0 = arith.constant 0 : i32
    %c0_i32_1 = arith.constant 0 : i32
    return %c0_i32, %c0_i32_0 : i32, i32
  }
  func.func @transform_3(%arg0: i32, %arg1: i32) -> (i32, i32, i32) {
    %c0_i32 = arith.constant 0 : i32
    %c0_i32_0 = arith.constant 0 : i32
    return %arg0, %c0_i32, %arg1 : i32, i32, i32
  }
}

</mosaic_0001>

<bundles_post_ra>
// kernel: tpu_custom_call.1
= control target key start
LH: loop header
LB: loop body
LE: loop exit
PB: predicated region body
PF: predicated region fallthrough
CT: control target
= control target key end

     0   :  { %8 = vsyncpa [#allocation3], 0  ;;  %s755_s0 = inlined_call_operand.hbm [shape: f32[2,8,256], index: 0, kind: input, shape index: {}]   ;;  %s756_s1 = inlined_call_operand.vmem [shape: f32[4,8], index: 1, kind: input, shape index: {}]   ;;  %s757_s2 = inlined_call_operand.vmem [shape: f32[4,1], index: 2, kind: input, shape index: {}]   ;;  %s758_s3 = inlined_call_operand.hbm [shape: f32[2,4,256], index: 3, kind: output, shape index: {}]  }
   0x1   :  { %10 = vsyncpa [#allocation3 + $0x1], 0 }
   0x2   :  { %11 = vsyncpa [#allocation4], 0 }
   0x3   :  { %13 = vsyncpa [#allocation4 + $0x1], 0  ;;  %s614_s12 = smov 0   ;;  %s616_s13 = smov 0  }
   0x4   :  { %s618_s14 = smov 0   ;;  %s620_s15 = smov 0  }
   0x5   :  { %s622_s16 = smov 0   ;;  %s624_s17 = smov 0  }
   0x6 LB: > { %s397_s18 = sadd.s32 4294967295, %s588_s17   ;;  %s398_s19 = sadd.s32 4294967294, %s588_s17   ;;  %s588_s17 = sphi %s624_s17, %s19_s17   ;;  %s584_s16 = sphi %s622_s16, %s770_s16   ;;  %s580_s15 = sphi %s620_s15, %s769_s15   ;;  %s576_s14 = sphi %s618_s14, %s768_s14   ;;  %s572_s13 = sphi %s616_s13, %s767_s13   ;;  %s568_s12 = sphi %s614_s12, %s766_s12  }
   0x7   : > { %s31_s20 = sadd.s32 1, %s584_s16  ;;  %s40_s21 = sadd.s32 1, %s576_s14 }
   0x8   : > { %p33_p0 = scmp.ge.s32.totalorder %s31_s20, 2  ;;  %p47_p1 = scmp.ne.s32.totalorder %s576_s14, %s572_s13 }
   0x9   : > { %p48_p2 = scmp.eq.s32.totalorder %s588_s17, 0  ;;  %p53_p3 = scmp.ne.s32.totalorder %s572_s13, %s568_s12 }
   0xa   : > { %s772_s20 = smov (%p33_p0, %s31_s20), 0  ;;  %p54_p5 = scmp.eq.s32.totalorder %s397_s18, 0 }
   0xb   : > { %p655_p4 = por %p48_p2, %p47_p1  ;;  %s35_s23 = ssub.s32 %s584_s16, %s772_s20 }
   0xc   : > { %p121_p6 = scmp.eq.s32.totalorder %s397_s18, 1  ;;  %p38_p7 = scmp.eq.s32.totalorder %s35_s23, 0 }
   0xd   : > { %p661_p8 = por %p54_p5, %p53_p3  ;;  %p127_p10 = scmp.eq.s32.totalorder %s398_s19, 1 }
   0xe   : > { %p665_p9 = por %p121_p6, %p47_p1  ;;  %p427_p13 = scmp.lt.s32.totalorder %s588_s17, 2 }
   0xf   : > { %s670_s26 = scalar_select %p38_p7, %s576_s14, %s40_s21  }
  0x10   : > { %p672_p11 = por %p127_p10, %p53_p3  ;;  %s153_s28 = sand.u32 1, %s576_s14  }
  0x11   : > { %s401_s29 = sshll.u32 %s153_s28, 4  ;;  %s413_s30 = sshll.u32 %s584_s16, 8 }
  0x12   : > { %s762_s27 = scalar_select %p672_p11, 1, 0 }
  0x13   : > { %s165_s6 = scalar_lea.hbm %s755_s0, %s413_s30  ;;  %s157_s7 = scalar_lea.vmem [#allocation2], %s401_s29 }
  0x14   : > { %s167_s8 = sshll.u32 %s157_s7, 4  ;;  %p685_p0 = pnand %p427_p13, %p655_p4  ;;  %s168_s8 = int_to_ptr.vmem [resolvable:$true] %s167_s8 }
  0x15   : > { %p404_p1 = scmp.ge.s32.totalorder %s588_s17, 1  ;;  %p172_p2 = scmp.lt.s32.totalorder %s588_s17, 3 }
  0x16   : > { %s154_s10 = scalar_lea.sflag [#allocation3], %s153_s28  ;;  %p482_p3 = pneg %p685_p0 }
  0x17   : > { %s493_s11 = scalar_lea.vmem %s168_s8, 256  ;;  %s590_s18 = smov [#allocation2]  }
  0x18   : > { %p494_p5 = scmp.ne.s32.totalorder %s168_s8, %s493_s11  ;;  %s498_s19 = sshll.u32 %s590_s18, 4  ;;  %s499_s19 = int_to_ptr.vmem [resolvable:$false] %s498_s19 }
  0x19   : > { %s500_s21 = scalar_lea.vmem %s499_s19, 512  ;;  %p501_p10 = scmp.lt.s32.totalorder %s168_s8, %s499_s19 }
  0x1a   : > { %p496_p6 = pnand %p494_p5, %p482_p3  ;;  %p502_p12 = scmp.lt.s32.totalorder %s500_s21, %s493_s11 }
  0x1c   : > { %p497_p7 = pneg %p496_p6  ;;  %p503_p4 = por %p502_p12, %p501_p10 }
  0x1e   : > { %p504_p13 = pnand %p503_p4, %p497_p7 }
  0x20   : > { %507 = shalt.err (!%p504_p13)
}
  0x21   : > { %422 = dma.hbm_to_vmem [thread:$0]  (!%p685_p0), %s165_s6, 256, %s168_s8, %s154_s10  }
  0x22   : > { %p173_p11 = pnand %p404_p1, %p172_p2 }
  0x23   : > { %s700_s22 = sand.u32 (!%p173_p11), 1, %s572_s13  }
  0x24   : > { %176 = sbr.rel (%p173_p11) target bundleno = 258 (0x102), region = 32  ;;  %s405_s23 = sshll.u32 (!%p173_p11), %s700_s22, 4 }
  0x25   : > { %s179_s28 = scalar_lea.sflag (!%p173_p11), [#allocation3], %s700_s22  ;;  %s182_s29 = scalar_lea.vmem (!%p173_p11), [#allocation2], %s405_s23 }
  0x29   : > { %559 = dma.done.wait (%p661_p8), %s179_s28, 256  }
  0x2a   : > { %561 = vsyncadd (%p661_p8), %s179_s28, 4294967040  ;;  %v591_v0 = vmov 0.0   ;;  %v592_v1 = vmov 0   ;;  %v208_v2 = vld [vmem:[%s182_s29 + $0x8] sm:$0xff]  ;;  %v207_v3 = vld [vmem:[%s182_s29] sm:$0xff]  ;;  %vm216_vm0 = vcmask 64512  }
  0x2b   : > { %284 = vmatprep.mubr.f32.mxu0 %v591_v0  ;;  %479 = vset.pattern.permute.xlu0 %v592_v1  ;;  %v209_v4 = vld [vmem:[%s756_s1] sm:$0xf]  ;;  %s406_s24 = sshll.u32 %s700_s22, 3  ;;  %s414_s7 = sshll.u32 %s580_s15, 7 }
  0x2c   : > { %250 = vmatprep.subr.mxu0 %v208_v2  ;;  %v210_v5 = vld [vmem:[%s757_s2] sm:$0xf]  ;;  %s204_s8 = scalar_lea.vmem [#allocation5], %s406_s24  ;;  %s311_s18 = scalar_lea.hbm %s758_s3, %s414_s7 }
  0x2d   : > { %251 = vmatpush1.msra.mxu0 %v207_v3  ;;  %213 = vperm.xlu0 %479, %v210_v5   ;;  %s313_s9 = sshll.u32 %s204_s8, 4  ;;  %s297_s19 = scalar_lea.sflag [#allocation4], %s700_s22  ;;  %s314_s9 = int_to_ptr.vmem [resolvable:$true] %s313_s9 }
  0x2e   : > { %407 = vmatmul.mubr.msk.f32.vlgmr.msra.gmra.mxu0 %vm216_vm0, %v209_v4  ;;  %s508_s21 = scalar_lea.vmem %s314_s9, 128  ;;  %s593_s23 = smov [#allocation5]  }
  0x2f   : > { %p509_p8 = scmp.ne.s32.totalorder %s314_s9, %s508_s21  ;;  %s512_s28 = sshll.u32 %s593_s23, 4  ;;  %s513_s28 = int_to_ptr.vmem [resolvable:$false] %s512_s28 }
  0x30   : > { %s514_s15 = scalar_lea.vmem %s513_s28, 256  ;;  %p515_p0 = scmp.lt.s32.totalorder %s314_s9, %s513_s28 }
  0x31   : > { %p510_p11 = pnand %p509_p8, %p665_p9  ;;  %p516_p1 = scmp.lt.s32.totalorder %s514_s15, %s508_s21 }
  0x33   : > { %p511_p12 = pneg %p510_p11  ;;  %p517_p2 = por %p516_p1, %p515_p0 }
  0x35   : > { %p518_p3 = pnand %p517_p2, %p511_p12 }
  0xa8   : > { %v214_v6 = vpop.permute.xlu0 %213 }
  0xee   : > { %v286_v7 = vpop.f32.mrf.mxu0 }
  0xef   : > { %v287_v9 = vadd.f32 %v286_v7, %v214_v6 }
  0xf0   : > { %v288_v8 = vpop.f32.mrf.mxu0 }
  0xf1   : > { %v289_v10 = vadd.f32 %v288_v8, %v214_v6 }
  0xf3   : > { %v293_v11 = vcombine.low %v287_v9, %v289_v10 }
  0xf5   : > { %295 = vst [vmem:[%s204_s8] sm:$0xff] %v293_v11 }
  0xf6   : > { %521 = shalt.err (!%p518_p3)
}
  0xf7   : > { %s522_s29 = scalar_lea.hbm %s311_s18, 128  ;;  %s526_s4 = scalar_lea.hbm %s758_s3, 256 }
  0xf8   : > { %p523_p5 = scmp.ne.s32.totalorder %s311_s18, %s522_s29  ;;  %p527_p10 = scmp.lt.s32.totalorder %s311_s18, %s758_s3 }
  0xf9   : > { %p528_p4 = scmp.lt.s32.totalorder %s526_s4, %s522_s29 }
  0xfa   : > { %p524_p6 = pnand %p523_p5, %p665_p9 }
  0xfb   : > { %p529_p13 = por %p528_p4, %p527_p10 }
  0xfc   : > { %p525_p7 = pneg %p524_p6 }
  0xfe   : > { %p530_p8 = pnand %p529_p13, %p525_p7 }
 0x100   : > { %533 = shalt.err (!%p530_p8)
}
 0x101   : > { %417 = dma.vmem_to_hbm [thread:$0]  (%p665_p9), %s314_s9, 128, %s311_s18, %s297_s19  }
 0x102 PF: > { %s325_s24 = sand.u32 1, %s568_s12   ;;  %p764_p11 = scmp.ne.s32.totalorder %s762_s27, 0 }
 0x103   : > { %p765_p12 = scmp.ge.s32.totalorder %s588_s17, 2  ;;  %s326_s7 = scalar_lea.sflag [#allocation4], %s325_s24 }
 0x105   : > { %p424_p0 = pnand %p765_p12, %p764_p11 }
 0x107   : > { %p425_p1 = pneg %p424_p0 }
 0x109   : > { %563 = dma.done.wait (%p425_p1), %s326_s7, 128  }
 0x10a   : > { %565 = vsyncadd (%p425_p1), %s326_s7, 4294967168  ;;  %s19_s17 = sadd.s32 1, %s588_s17   ;;  %s766_s12 = smov %s572_s13 }
 0x10b   : > { %p16_p2 = scmp.ge.s32.totalorder %s19_s17, 4   ;;  %s767_s13 = smov %s576_s14 }
 0x10c   : > { %s768_s14 = smov %s670_s26  ;;  %s769_s15 = smov %s584_s16 }
 0x10d   : > { %s770_s16 = smov %s772_s20  ;;  %18 = sbr.rel (!%p16_p2) target bundleno = 6 (0x6), region = 77 }
 0x112   :  { %331 = vsyncpa [#allocation3], 1 }
 0x113   :  { %333 = vsyncpa [#allocation3 + $0x1], 1 }
 0x114   :  { %334 = vsyncpa [#allocation4], 1 }
 0x115   :  { %336 = vsyncpa [#allocation4 + $0x1], 1 }

</bundles_post_ra>
